<compile_context>
chip_gen: v6e
topology: v6e:2x2x1
jax: 0.10.0
libtpu: 0.0.40
codegen_flags: <defaults>
</compile_context>

<pallas_src>
import functools

import jax
import jax.numpy as jnp
from jax.experimental import pallas as pl
from jax.experimental.pallas import tpu as pltpu

_IN_FEATURES = 128
_HIDDEN = 256


def _clf_kernel(x_ref, w_ref, b_ref, o_ref, *, nc_pad):
    # x_ref: (TB, 128) f32|bf16  activations for this batch tile
    # w_ref: (640, 256) bf16     packed [w1(128,256); w2(256,256); w3_pad(256,256)]
    # b_ref: (3, 256) f32        packed [b1; b2; b3_pad(-1e30 in padded lanes)]
    # o_ref: (TB, nc_pad)        logits (lane-padded to a multiple of 128)
    h = x_ref[...]
    if h.dtype != jnp.bfloat16:          # skip the cast if producer is already bf16
        h = h.astype(jnp.bfloat16)

    # fc1 + ReLU (bf16 operands, f32 accumulate; bias/ReLU in f32 -- VPU filler)
    h = jnp.dot(h, w_ref[0:128, :], preferred_element_type=jnp.float32) + b_ref[0:1, :]
    h = jnp.maximum(h, 0.0).astype(jnp.bfloat16)

    # fc2 + ReLU
    h = jnp.dot(h, w_ref[128:384, :], preferred_element_type=jnp.float32) + b_ref[1:2, :]
    h = jnp.maximum(h, 0.0).astype(jnp.bfloat16)

    # fc3 -> logits (no activation); padded lanes carry -1e30 from the bias pad.
    h = (jnp.dot(h, w_ref[384:640, 0:nc_pad], preferred_element_type=jnp.float32)
         + b_ref[2:3, 0:nc_pad])
    o_ref[...] = h.astype(o_ref.dtype)


def _init_linear(key, in_f, out_f):
    # PyTorch nn.Linear default init: U(-1/sqrt(in), 1/sqrt(in)) for W and b.
    kw, kb = jax.random.split(key)
    bound = 1.0 / jnp.sqrt(jnp.float32(in_f))
    w = jax.random.uniform(kw, (in_f, out_f), jnp.float32, -bound, bound)  # [in, out]
    b = jax.random.uniform(kb, (out_f,), jnp.float32, -bound, bound)
    return w, b


def init_params(key, nb_classes):
    """Returns (w_slab bf16 (640,256), b_slab f32 (3,256)).

    w3 is zero-padded and b3 is padded with -1e30 so padded logit lanes are
    ~-inf: harmless to downstream softmax/argmax if the padded output is
    consumed directly (return_padded=True path).
    """
    assert 0 < nb_classes <= _HIDDEN, "this packing assumes nb_classes <= 256"
    k1, k2, k3 = jax.random.split(key, 3)
    w1, b1 = _init_linear(k1, _IN_FEATURES, _HIDDEN)   # (128, 256)
    w2, b2 = _init_linear(k2, _HIDDEN, _HIDDEN)        # (256, 256)
    w3, b3 = _init_linear(k3, _HIDDEN, nb_classes)     # (256, nb_classes)

    pad = _HIDDEN - nb_classes
    w3p = jnp.pad(w3, ((0, 0), (0, pad)))
    b3p = jnp.pad(b3, ((0, pad),), constant_values=-1e30)

    w_slab = jnp.concatenate([w1, w2, w3p], axis=0).astype(jnp.bfloat16)  # (640, 256)
    b_slab = jnp.stack([b1, b2, b3p], axis=0)                             # (3, 256) f32
    return w_slab, b_slab


def _round_up(x, m):
    return ((x + m - 1) // m) * m


def _pick_batch_tiling(batch):
    """Pick (b_pad, tb).  Big tiles amortize the ~0.35 us/step grid overhead;
    for mid-size batches force exactly 2 tiles so both v7x TensorCores get
    work (harmless on 1-TC v5e/v6e)."""
    b_pad = _round_up(batch, 8)
    if b_pad <= 256:
        tb = b_pad                       # single tile
    elif b_pad <= 2048:
        b_pad = _round_up(b_pad, 16)
        tb = b_pad // 2                  # 2 tiles, one per TC on v7x
    else:
        tb = 1024                        # large batches: 1024-row tiles
        b_pad = _round_up(b_pad, tb)
    return b_pad, tb


@functools.partial(jax.jit,
                   static_argnames=("nb_classes", "return_padded", "logits_dtype"))
def classifier_forward(x, w_slab, b_slab, *, nb_classes,
                       return_padded=False, logits_dtype=jnp.float32):
    B, F = x.shape
    assert F == _IN_FEATURES, "Classifier_128_features expects 128 input features"
    nc_pad = 128 * pl.cdiv(nb_classes, 128)   # lane-dense (unmasked vst) output
    assert nc_pad <= _HIDDEN

    b_pad, tb = _pick_batch_tiling(B)
    x_p = jnp.pad(x, ((0, b_pad - B), (0, 0))) if b_pad != B else x

    out = pl.pallas_call(
        functools.partial(_clf_kernel, nc_pad=nc_pad),
        out_shape=jax.ShapeDtypeStruct((b_pad, nc_pad), logits_dtype),
        grid=(b_pad // tb,),
        in_specs=[
            pl.BlockSpec((tb, _IN_FEATURES), lambda i: (i, 0)),   # activations
            pl.BlockSpec(w_slab.shape, lambda i: (0, 0)),         # resident weights
            pl.BlockSpec(b_slab.shape, lambda i: (0, 0)),         # resident biases
        ],
        out_specs=pl.BlockSpec((tb, nc_pad), lambda i: (i, 0)),
        compiler_params=pltpu.CompilerParams(
            dimension_semantics=("parallel",)),
    )(x_p, w_slab, b_slab)

    if return_padded:
        # (b_pad, nc_pad): padded logit lanes are ~-inf, padded batch rows are
        # junk -- intended for direct softmax/argmax consumption without the
        # extra HBM slice pass.
        return out
    return out[:B, :nb_classes]


def _reference_forward(x, w_slab, b_slab, nb_classes):
    # Same bf16-operand / f32-accumulate numerics as the kernel.
    w1 = w_slab[0:128, :]
    w2 = w_slab[128:384, :]
    w3 = w_slab[384:640, 0:nb_classes]
    b1 = b_slab[0]
    b2 = b_slab[1]
    b3 = b_slab[2, 0:nb_classes]

    def lin(h, w, b):
        return jnp.dot(h.astype(jnp.bfloat16), w,
                       preferred_element_type=jnp.float32) + b

    h = jnp.maximum(lin(x, w1, b1), 0.0)
    h = jnp.maximum(lin(h, w2, b2), 0.0)
    return lin(h, w3, b3)


if __name__ == "__main__":
    key = jax.random.PRNGKey(0)
    kx, kp, kx2 = jax.random.split(key, 3)

    NB_CLASSES = 10
    w_slab, b_slab = init_params(kp, NB_CLASSES)

    # Small batch: single-tile path.
    B = 8
    x = jax.random.normal(kx, (B, _IN_FEATURES), jnp.float32)
    out = jax.block_until_ready(
        classifier_forward(x, w_slab, b_slab, nb_classes=NB_CLASSES))
    ref = _reference_forward(x, w_slab, b_slab, NB_CLASSES)
    assert out.shape == (B, NB_CLASSES)
    assert jnp.allclose(out, ref, atol=2e-3, rtol=2e-3), "mismatch vs JAX reference"

    # Moderate batch: exercises batch padding + the 2-tile grid (1 tile / TC on v7x).
    B2 = 300
    x2 = jax.random.normal(kx2, (B2, _IN_FEATURES), jnp.float32)
    out2 = jax.block_until_ready(
        classifier_forward(x2, w_slab, b_slab, nb_classes=NB_CLASSES))
    ref2 = _reference_forward(x2, w_slab, b_slab, NB_CLASSES)
    assert out2.shape == (B2, NB_CLASSES)
    assert jnp.allclose(out2, ref2, atol=2e-3, rtol=2e-3), "mismatch vs JAX reference"

    print("KERNEL_OK")
</pallas_src>

<mosaic_0001>
module attributes {stable_mosaic.version = 11 : i64} {
  func.func @_clf_kernel(%arg0: i32, %arg1: memref<8x128xf32, #tpu.memory_space<vmem>>, %arg2: memref<640x256xbf16, #tpu.memory_space<vmem>>, %arg3: memref<3x256xf32, #tpu.memory_space<vmem>>, %arg4: memref<8x128xf32, #tpu.memory_space<vmem>>) attributes {dimension_semantics = [#tpu.dimension_semantics<parallel>], iteration_bounds = array<i64: 1>, scalar_prefetch = 0 : i64, scratch_operands = 0 : i64, tpu.core_type = #tpu.core_type<tc>, window_params = [{transform_indices = @transform_0, window_bounds = array<i64: 8, 128>}, {pipeline_mode = #tpu.pipeline_mode<synchronous>, transform_indices = @transform_1, window_bounds = array<i64: 640, 256>}, {pipeline_mode = #tpu.pipeline_mode<synchronous>, transform_indices = @transform_2, window_bounds = array<i64: 3, 256>}, {transform_indices = @transform_3, window_bounds = array<i64: 8, 128>}]} {
    %c0 = arith.constant 0 : index
    %c0_0 = arith.constant 0 : index
    %0 = vector.load %arg1[%c0, %c0_0] : memref<8x128xf32, #tpu.memory_space<vmem>>, vector<8x128xf32>
    %1 = arith.truncf %0 : vector<8x128xf32> to vector<8x128xbf16>
    %c0_1 = arith.constant 0 : index
    %c0_2 = arith.constant 0 : index
    %2 = vector.load %arg2[%c0_1, %c0_2] : memref<640x256xbf16, #tpu.memory_space<vmem>>, vector<128x256xbf16>
    %cst = arith.constant dense<0.000000e+00> : vector<8x256xf32>
    %3 = tpu.matmul %1, %2, %cst {dimension_numbers = #tpu.dot_dimension_numbers<[1], [0], [0], [1], [0, 0, 1, 1], [], []>} : vector<8x128xbf16>, vector<128x256xbf16>, vector<8x256xf32> -> vector<8x256xf32>
    %c0_3 = arith.constant 0 : index
    %c0_4 = arith.constant 0 : index
    %4 = vector.load %arg3[%c0_3, %c0_4] : memref<3x256xf32, #tpu.memory_space<vmem>>, vector<1x256xf32>
    %5 = vector.broadcast %4 : vector<1x256xf32> to vector<8x256xf32>
    %6 = arith.addf %3, %5 : vector<8x256xf32>
    %cst_5 = arith.constant 0.000000e+00 : f32
    %7 = vector.broadcast %cst_5 : f32 to vector<8x256xf32>
    %8 = arith.maximumf %6, %7 : vector<8x256xf32>
    %9 = arith.truncf %8 : vector<8x256xf32> to vector<8x256xbf16>
    %c128 = arith.constant 128 : index
    %c0_6 = arith.constant 0 : index
    %10 = vector.load %arg2[%c128, %c0_6] : memref<640x256xbf16, #tpu.memory_space<vmem>>, vector<256x256xbf16>
    %cst_7 = arith.constant dense<0.000000e+00> : vector<8x256xf32>
    %11 = tpu.matmul %9, %10, %cst_7 {dimension_numbers = #tpu.dot_dimension_numbers<[1], [0], [0], [1], [0, 0, 1, 1], [], []>} : vector<8x256xbf16>, vector<256x256xbf16>, vector<8x256xf32> -> vector<8x256xf32>
    %c1 = arith.constant 1 : index
    %c0_8 = arith.constant 0 : index
    %12 = vector.load %arg3[%c1, %c0_8] : memref<3x256xf32, #tpu.memory_space<vmem>>, vector<1x256xf32>
    %13 = vector.broadcast %12 : vector<1x256xf32> to vector<8x256xf32>
    %14 = arith.addf %11, %13 : vector<8x256xf32>
    %cst_9 = arith.constant 0.000000e+00 : f32
    %15 = vector.broadcast %cst_9 : f32 to vector<8x256xf32>
    %16 = arith.maximumf %14, %15 : vector<8x256xf32>
    %17 = arith.truncf %16 : vector<8x256xf32> to vector<8x256xbf16>
    %c384 = arith.constant 384 : index
    %c0_10 = arith.constant 0 : index
    %18 = vector.load %arg2[%c384, %c0_10] : memref<640x256xbf16, #tpu.memory_space<vmem>>, vector<256x128xbf16>
    %cst_11 = arith.constant dense<0.000000e+00> : vector<8x128xf32>
    %19 = tpu.matmul %17, %18, %cst_11 {dimension_numbers = #tpu.dot_dimension_numbers<[1], [0], [0], [1], [0, 0, 1, 1], [], []>} : vector<8x256xbf16>, vector<256x128xbf16>, vector<8x128xf32> -> vector<8x128xf32>
    %c2 = arith.constant 2 : index
    %c0_12 = arith.constant 0 : index
    %20 = vector.load %arg3[%c2, %c0_12] : memref<3x256xf32, #tpu.memory_space<vmem>>, vector<1x128xf32>
    %21 = vector.broadcast %20 : vector<1x128xf32> to vector<8x128xf32>
    %22 = arith.addf %19, %21 : vector<8x128xf32>
    %c0_13 = arith.constant 0 : index
    %c0_14 = arith.constant 0 : index
    %23 = vector.load %arg4[%c0_13, %c0_14] : memref<8x128xf32, #tpu.memory_space<vmem>>, vector<8x128xf32>
    tpu.vector_store %arg4[%c0_13, %c0_14], %22 {strides = array<i32>} : memref<8x128xf32, #tpu.memory_space<vmem>>, vector<8x128xf32>,
    return
  }
  func.func @transform_0(%arg0: i32) -> (i32, i32) {
    %c0_i32 = arith.constant 0 : i32
    %c0_i32_0 = arith.constant 0 : i32
    return %arg0, %c0_i32 : i32, i32
  }
  func.func @transform_1(%arg0: i32) -> (i32, i32) {
    %c0_i32 = arith.constant 0 : i32
    %c0_i32_0 = arith.constant 0 : i32
    %c0_i32_1 = arith.constant 0 : i32
    return %c0_i32, %c0_i32_0 : i32, i32
  }
  func.func @transform_2(%arg0: i32) -> (i32, i32) {
    %c0_i32 = arith.constant 0 : i32
    %c0_i32_0 = arith.constant 0 : i32
    %c0_i32_1 = arith.constant 0 : i32
    return %c0_i32, %c0_i32_0 : i32, i32
  }
  func.func @transform_3(%arg0: i32) -> (i32, i32) {
    %c0_i32 = arith.constant 0 : i32
    %c0_i32_0 = arith.constant 0 : i32
    return %arg0, %c0_i32 : i32, i32
  }
}

</mosaic_0001>

<bundles_post_ra>
// kernel: classifier_forward.1
= control target key start
LH: loop header
LB: loop body
LE: loop exit
PB: predicated region body
PF: predicated region fallthrough
CT: control target
= control target key end

     0   :  { %8 = vsyncpa [#allocation3], 0  ;;  %s955_s0 = inlined_call_operand.hbm [shape: f32[8,128], index: 0, kind: input, shape index: {}]   ;;  %s956_s1 = inlined_call_operand.hbm [shape: bf16[640,256], index: 1, kind: input, shape index: {}]   ;;  %s957_s2 = inlined_call_operand.hbm [shape: f32[3,256], index: 2, kind: input, shape index: {}]   ;;  %s958_s3 = inlined_call_operand.hbm [shape: f32[8,128], index: 3, kind: output, shape index: {}]  }
   0x1   :  { %9 = vsyncpa [#allocation6], 0 }
   0x2   :  { %10 = vsyncpa [#allocation4], 0  ;;  %s916_s12 = smov [#allocation5]  }
   0x3   :  { %s26_s13 = sshll.u32 %s916_s12, 4  ;;  %s27_s13 = int_to_ptr.vmem [resolvable:$true] %s26_s13 }
   0x4   :  { %s838_s14 = scalar_lea.vmem %s27_s13, 10240  ;;  %p843_p1 = scmp.lt.s32.totalorder %s27_s13, %s27_s13 }
   0x5   :  { %p839_p0 = scmp.ne.s32.totalorder %s27_s13, %s838_s14  ;;  %p844_p2 = scmp.lt.s32.totalorder %s838_s14, %s838_s14 }
   0x7   :  { %p845_p3 = por %p844_p2, %p843_p1 }
   0x9   :  { %p846_p4 = pnand %p845_p3, %p839_p0 }
   0xb   :  { %849 = shalt.err (!%p846_p4)
}
   0xc   :  { %s917_s15 = smov 128   ;;  %s918_s16 = smov 8  }
   0xd   :  { %32 = dma.hbm_to_vmem [thread:$0]  %s956_s1, 10240, %s27_s13, [#allocation6], %s917_s15, %s917_s15, %s918_s16  }
   0xe   :  { %s919_s19 = smov [#allocation2]   ;;  %s920_s21 = smov [#allocation7]  }
   0xf   :  { %s17_s20 = sshll.u32 %s919_s19, 4  ;;  %s39_s22 = sshll.u32 %s920_s21, 4  ;;  %s18_s20 = int_to_ptr.vmem [resolvable:$true] %s17_s20  ;;  %s40_s22 = int_to_ptr.vmem [resolvable:$true] %s39_s22 }
  0x10   :  { %s858_s23 = scalar_lea.vmem %s18_s20, 128  ;;  %p863_p6 = scmp.lt.s32.totalorder %s18_s20, %s18_s20 }
  0x11   :  { %p859_p5 = scmp.ne.s32.totalorder %s18_s20, %s858_s23  ;;  %p864_p7 = scmp.lt.s32.totalorder %s858_s23, %s858_s23 }
  0x13   :  { %p865_p8 = por %p864_p7, %p863_p6 }
  0x15   :  { %p866_p9 = pnand %p865_p8, %p859_p5 }
  0x17   :  { %869 = shalt.err (!%p866_p9)
}
  0x18   :  { %20 = dma.hbm_to_vmem [thread:$0]  %s955_s0, 128, %s18_s20, [#allocation3]  }
  0x19   :  { %s878_s26 = scalar_lea.vmem %s40_s22, 128  ;;  %p883_p11 = scmp.lt.s32.totalorder %s40_s22, %s40_s22 }
  0x1a   :  { %p879_p10 = scmp.ne.s32.totalorder %s40_s22, %s878_s26  ;;  %p884_p12 = scmp.lt.s32.totalorder %s878_s26, %s878_s26 }
  0x1c   :  { %p885_p13 = por %p884_p12, %p883_p11 }
  0x1e   :  { %p886_p0 = pnand %p885_p13, %p879_p10 }
  0x20   :  { %889 = shalt.err (!%p886_p0)
}
  0x21   :  { %42 = dma.hbm_to_vmem [thread:$0]  %s957_s2, 128, %s40_s22, [#allocation6]  }
  0x22   :  { %910 = dma.done.wait [#allocation3], 128  }
  0x23   :  { %911 = vsyncadd [#allocation3], 4294967168 }
  0x24   :  { %912 = dma.done.wait [#allocation6], 10368  }
  0x25   :  { %913 = vsyncadd [#allocation6], 4294956928  ;;  %v921_v0 = vmov 0   ;;  %v742_v1 = vld [vmem:[#allocation5 + $0x74] ss:$8 sps:$4 sm:$0xff]   ;;  %v73_v63 = vlaneseq  ;;  %s922_s0 = smov [#allocation8]  }
  0x26   :  { %195 = vmatprep.mubr.bf16.mxu0 %v921_v0  ;;  %v744_v2 = vld [vmem:[#allocation5 + $0x70] ss:$8 sps:$4 sm:$0xff]   ;;  %163 = vmatprep.subr.bf16.mxu0 %v742_v1  ;;  %v745_v3 = vld [vmem:[#allocation5 + $0x64] ss:$8 sps:$4 sm:$0xff]   ;;  %v747_v4 = vld [vmem:[#allocation5 + $0x60] ss:$8 sps:$4 sm:$0xff]  }
  0x27   :  { %164 = vmatpush1.bf16.msra.mxu0 %v744_v2  ;;  %v748_v5 = vld [vmem:[#allocation5 + $0x54] ss:$8 sps:$4 sm:$0xff]   ;;  %v750_v6 = vld [vmem:[#allocation5 + $0x50] ss:$8 sps:$4 sm:$0xff]   ;;  %v751_v7 = vld [vmem:[#allocation5 + $0x44] ss:$8 sps:$4 sm:$0xff]  }
  0x28   :  { %165 = vmatprep.subr.bf16.mxu0 %v745_v3  ;;  %v753_v8 = vld [vmem:[#allocation5 + $0x40] ss:$8 sps:$4 sm:$0xff]   ;;  %v754_v9 = vld [vmem:[#allocation5 + $0x34] ss:$8 sps:$4 sm:$0xff]   ;;  %v768_v11 = vld [vmem:[#allocation5 + $0xf0] ss:$8 sps:$4 sm:$0xff]  }
  0x29   :  { %v766_v10 = vld [vmem:[#allocation5 + $0xf4] ss:$8 sps:$4 sm:$0xff]   ;;  %v769_v12 = vld [vmem:[#allocation5 + $0xe4] ss:$8 sps:$4 sm:$0xff]   ;;  %v756_v13 = vld [vmem:[#allocation5 + $0x30] ss:$8 sps:$4 sm:$0xff]  }
  0x2a   :  { %413 = vmatprep.subr.bf16.mxu1 %v766_v10  ;;  %v771_v14 = vld [vmem:[#allocation5 + $0xe0] ss:$8 sps:$4 sm:$0xff]   ;;  %v772_v15 = vld [vmem:[#allocation5 + $0xd4] ss:$8 sps:$4 sm:$0xff]   ;;  %v757_v16 = vld [vmem:[#allocation5 + $0x24] ss:$8 sps:$4 sm:$0xff]  }
  0x2b   :  { %166 = vmatpush1.bf16.msra.mxu0 %v747_v4  ;;  %414 = vmatpush1.bf16.msra.mxu1 %v768_v11  ;;  %v759_v17 = vld [vmem:[#allocation5 + $0x20] ss:$8 sps:$4 sm:$0xff]   ;;  %v774_v18 = vld [vmem:[#allocation5 + $0xd0] ss:$8 sps:$4 sm:$0xff]   ;;  %v775_v19 = vld [vmem:[#allocation5 + $0xc4] ss:$8 sps:$4 sm:$0xff]  }
  0x2c   :  { %167 = vmatprep.subr.bf16.mxu0 %v748_v5  ;;  %415 = vmatprep.subr.bf16.mxu1 %v769_v12  ;;  %v760_v20 = vld [vmem:[#allocation5 + $0x14] ss:$8 sps:$4 sm:$0xff]   ;;  %v762_v21 = vld [vmem:[#allocation5 + $0x10] ss:$8 sps:$4 sm:$0xff]   ;;  %v777_v22 = vld [vmem:[#allocation5 + $0xc0] ss:$8 sps:$4 sm:$0xff]  }
  0x2d   :  { %v778_v23 = vld [vmem:[#allocation5 + $0xb4] ss:$8 sps:$4 sm:$0xff]   ;;  %v763_v24 = vld [vmem:[#allocation5 + $0x4] ss:$8 sps:$4 sm:$0xff]   ;;  %v765_v25 = vld [vmem:[#allocation5] ss:$8 sps:$4 sm:$0xff]  }
  0x2e   :  { %v53_v26 = vld [vmem:[#allocation2] sm:$0xff]  ;;  %v781_v28 = vld [vmem:[#allocation5 + $0xa4] ss:$8 sps:$4 sm:$0xff]   ;;  %v783_v29 = vld [vmem:[#allocation5 + $0xa0] ss:$8 sps:$4 sm:$0xff]   ;;  %v74_v0 = vshrl.u32 %v73_v63, 7 }
  0x2f   :  { %168 = vmatpush1.bf16.msra.mxu0 %v750_v6  ;;  %416 = vmatpush1.bf16.msra.mxu1 %v771_v14  ;;  %v780_v27 = vld [vmem:[#allocation5 + $0xb0] ss:$8 sps:$4 sm:$0xff]   ;;  %v54_v30 = vpack.c.bf16 %v53_v26, %v53_v26  ;;  %v784_v31 = vld [vmem:[#allocation5 + $0x94] ss:$8 sps:$4 sm:$0xff]   ;;  %v787_v33 = vld [vmem:[#allocation5 + $0x84] ss:$8 sps:$4 sm:$0xff]  }
  0x30   :  { %169 = vmatprep.subr.bf16.mxu0 %v751_v7  ;;  %417 = vmatprep.subr.bf16.mxu1 %v772_v15  ;;  %v786_v32 = vld [vmem:[#allocation5 + $0x90] ss:$8 sps:$4 sm:$0xff]   ;;  %v789_v34 = vld [vmem:[#allocation5 + $0x80] ss:$8 sps:$4 sm:$0xff]   ;;  %v790_v35 = vld [vmem:[#allocation5 + $0x174] ss:$8 sps:$4 sm:$0xff]  }
  0x31   :  { %v792_v36 = vld [vmem:[#allocation5 + $0x170] ss:$8 sps:$4 sm:$0xff]   ;;  %v793_v37 = vld [vmem:[#allocation5 + $0x164] ss:$8 sps:$4 sm:$0xff]   ;;  %v795_v38 = vld [vmem:[#allocation5 + $0x160] ss:$8 sps:$4 sm:$0xff]  }
  0x32   :  { %v796_v39 = vld [vmem:[#allocation5 + $0x154] ss:$8 sps:$4 sm:$0xff]   ;;  %v798_v40 = vld [vmem:[#allocation5 + $0x150] ss:$8 sps:$4 sm:$0xff]   ;;  %v799_v41 = vld [vmem:[#allocation5 + $0x144] ss:$8 sps:$4 sm:$0xff]  }
  0x33   :  { %170 = vmatpush1.bf16.msra.mxu0 %v753_v8  ;;  %418 = vmatpush1.bf16.msra.mxu1 %v774_v18  ;;  %v801_v42 = vld [vmem:[#allocation5 + $0x140] ss:$8 sps:$4 sm:$0xff]   ;;  %v802_v43 = vld [vmem:[#allocation5 + $0x134] ss:$8 sps:$4 sm:$0xff]   ;;  %v804_v44 = vld [vmem:[#allocation5 + $0x130] ss:$8 sps:$4 sm:$0xff]  }
  0x34   :  { %171 = vmatprep.subr.bf16.mxu0 %v754_v9  ;;  %419 = vmatprep.subr.bf16.mxu1 %v775_v19  ;;  %v805_v45 = vld [vmem:[#allocation5 + $0x124] ss:$8 sps:$4 sm:$0xff]   ;;  %v807_v46 = vld [vmem:[#allocation5 + $0x120] ss:$8 sps:$4 sm:$0xff]   ;;  %v808_v47 = vld [vmem:[#allocation5 + $0x114] ss:$8 sps:$4 sm:$0xff]  }
  0x35   :  { %v810_v48 = vld [vmem:[#allocation5 + $0x110] ss:$8 sps:$4 sm:$0xff]   ;;  %v811_v49 = vld [vmem:[#allocation5 + $0x104] ss:$8 sps:$4 sm:$0xff]   ;;  %v813_v50 = vld [vmem:[#allocation5 + $0x100] ss:$8 sps:$4 sm:$0xff]  }
  0x36   :  { %v814_v51 = vld [vmem:[#allocation5 + $0x270] ss:$8 sps:$4 sm:$0xff]   ;;  %v816_v53 = vld [vmem:[#allocation5 + $0x260] ss:$8 sps:$4 sm:$0xff]   ;;  %v75_v1 = vsub.s32 0, %v74_v0  ;;  %v79_v3 = vsub.s32 1, %v74_v0 }
  0x37   :  { %172 = vmatpush1.bf16.msra.mxu0 %v756_v13  ;;  %420 = vmatpush1.bf16.msra.mxu1 %v777_v22  ;;  %v815_v52 = vld [vmem:[#allocation5 + $0x1f0] ss:$8 sps:$4 sm:$0xff]   ;;  %v817_v54 = vld [vmem:[#allocation5 + $0x1e0] ss:$8 sps:$4 sm:$0xff]   ;;  %s638_s2 = sshll.u32 %s922_s0, 4  ;;  %s639_s2 = int_to_ptr.vmem [resolvable:$true] %s638_s2 }
  0x38   :  { %173 = vmatprep.subr.bf16.mxu0 %v757_v16  ;;  %421 = vmatprep.subr.bf16.mxu1 %v778_v23  ;;  %v818_v55 = vld [vmem:[#allocation5 + $0x250] ss:$8 sps:$4 sm:$0xff]   ;;  %v820_v57 = vld [vmem:[#allocation5 + $0x240] ss:$8 sps:$4 sm:$0xff]   ;;  %s890_s28 = scalar_lea.vmem %s639_s2, 128  ;;  %p895_p2 = scmp.lt.s32.totalorder %s639_s2, %s639_s2 }
  0x39   :  { %v819_v56 = vld [vmem:[#allocation5 + $0x1d0] ss:$8 sps:$4 sm:$0xff]   ;;  %v821_v58 = vld [vmem:[#allocation5 + $0x1c0] ss:$8 sps:$4 sm:$0xff]   ;;  %p891_p1 = scmp.ne.s32.totalorder %s639_s2, %s890_s28  ;;  %p896_p3 = scmp.lt.s32.totalorder %s890_s28, %s890_s28 }
  0x3a   :  { %v822_v59 = vld [vmem:[#allocation5 + $0x230] ss:$8 sps:$4 sm:$0xff]   ;;  %v824_v61 = vld [vmem:[#allocation5 + $0x220] ss:$8 sps:$4 sm:$0xff]  }
  0x3b   :  { %174 = vmatpush1.bf16.msra.mxu0 %v759_v17  ;;  %422 = vmatpush1.bf16.msra.mxu1 %v780_v27  ;;  %v823_v60 = vld [vmem:[#allocation5 + $0x1b0] ss:$8 sps:$4 sm:$0xff]   ;;  %v825_v62 = vld [vmem:[#allocation5 + $0x1a0] ss:$8 sps:$4 sm:$0xff]   ;;  %p897_p4 = por %p896_p3, %p895_p2 }
  0x3c   :  { %175 = vmatprep.subr.bf16.mxu0 %v760_v20  ;;  %423 = vmatprep.subr.bf16.mxu1 %v781_v28  ;;  %v71_v2 = vld [vmem:[#allocation7] ss:$4 sm:$0x3]  ;;  %v826_v16 = vld [vmem:[#allocation5 + $0x210] ss:$8 sps:$4 sm:$0xff]  }
  0x3d   :  { %v76_v4 = vrot.slane %v71_v2, %v75_v1  ;;  %v80_v5 = vrot.slane %v71_v2, %v79_v3  ;;  %v827_v17 = vld [vmem:[#allocation5 + $0x190] ss:$8 sps:$4 sm:$0xff]   ;;  %v828_v18 = vld [vmem:[#allocation5 + $0x200] ss:$8 sps:$4 sm:$0xff]   ;;  %p898_p5 = pnand %p897_p4, %p891_p1 }
  0x3e   :  { %v829_v19 = vld [vmem:[#allocation5 + $0x180] ss:$8 sps:$4 sm:$0xff]  }
  0x3f   :  { %176 = vmatpush1.bf16.msra.mxu0 %v762_v21  ;;  %424 = vmatpush1.bf16.msra.mxu1 %v783_v29  ;;  %v241_v20 = vld [vmem:[#allocation7 + $0x1] ss:$4 sm:$0x3] }
  0x40   :  { %177 = vmatprep.subr.bf16.mxu0 %v763_v24  ;;  %425 = vmatprep.subr.bf16.mxu1 %v784_v31  ;;  %v246_v21 = vrot.slane %v241_v20, %v75_v1  ;;  %v250_v22 = vrot.slane %v241_v20, %v79_v3 }
  0x43   :  { %178 = vmatpush1.bf16.msra.mxu0 %v765_v25  ;;  %426 = vmatpush1.bf16.msra.mxu1 %v786_v32 }
  0x44   :  { %427 = vmatprep.subr.bf16.mxu1 %v787_v33  ;;  %713 = vmatprep.subr.bf16.mxu0 %v814_v51 }
  0x46   :  { %196 = vmatmul.mubr.bf16.vlgmr.msra.gmra.mxu0 %v54_v30 }
  0x47   :  { %428 = vmatpush1.bf16.msra.mxu1 %v789_v34  ;;  %714 = vmatpush3.bf16.msra.mxu0 %v815_v52  ;;  %v696_v34 = vld [vmem:[#allocation7 + $0x2] ss:$0 sm:$0xff] }
  0x48   :  { %429 = vmatprep.subr.bf16.mxu1 %v790_v35  ;;  %715 = vmatprep.subr.bf16.mxu0 %v816_v53 }
  0x4b   :  { %430 = vmatpush2.bf16.msra.mxu1 %v792_v36  ;;  %716 = vmatpush3.bf16.msra.mxu0 %v817_v54 }
  0x4c   :  { %431 = vmatprep.subr.bf16.mxu1 %v793_v37  ;;  %717 = vmatprep.subr.bf16.mxu0 %v818_v55 }
  0x4f   :  { %432 = vmatpush2.bf16.msra.mxu1 %v795_v38  ;;  %718 = vmatpush3.bf16.msra.mxu0 %v819_v56 }
  0x50   :  { %433 = vmatprep.subr.bf16.mxu1 %v796_v39  ;;  %719 = vmatprep.subr.bf16.mxu0 %v820_v57 }
  0x53   :  { %434 = vmatpush2.bf16.msra.mxu1 %v798_v40  ;;  %720 = vmatpush3.bf16.msra.mxu0 %v821_v58 }
  0x54   :  { %435 = vmatprep.subr.bf16.mxu1 %v799_v41  ;;  %721 = vmatprep.subr.bf16.mxu0 %v822_v59 }
  0x57   :  { %436 = vmatpush2.bf16.msra.mxu1 %v801_v42  ;;  %722 = vmatpush3.bf16.msra.mxu0 %v823_v60 }
  0x58   :  { %437 = vmatprep.subr.bf16.mxu1 %v802_v43  ;;  %723 = vmatprep.subr.bf16.mxu0 %v824_v61 }
  0x5b   :  { %438 = vmatpush2.bf16.msra.mxu1 %v804_v44  ;;  %724 = vmatpush3.bf16.msra.mxu0 %v825_v62 }
  0x5c   :  { %439 = vmatprep.subr.bf16.mxu1 %v805_v45  ;;  %725 = vmatprep.subr.bf16.mxu0 %v826_v16 }
  0x5f   :  { %440 = vmatpush2.bf16.msra.mxu1 %v807_v46  ;;  %726 = vmatpush3.bf16.msra.mxu0 %v827_v17 }
  0x60   :  { %441 = vmatprep.subr.bf16.mxu1 %v808_v47  ;;  %727 = vmatprep.subr.bf16.mxu0 %v828_v18 }
  0x63   :  { %442 = vmatpush2.bf16.msra.mxu1 %v810_v48  ;;  %728 = vmatpush3.bf16.msra.mxu0 %v829_v19 }
  0x64   :  { %443 = vmatprep.subr.bf16.mxu1 %v811_v49 }
  0x67   :  { %444 = vmatpush2.bf16.msra.mxu1 %v813_v50 }
 0x106   :  { %v197_v6 = vpop.f32.mrf.mxu0 }
 0x107   :  { %v198_v7 = vadd.f32 %v197_v6, %v76_v4 }
 0x108   :  { %v199_v8 = vpop.f32.mrf.mxu0 }
 0x109   :  { %v200_v9 = vadd.f32 %v199_v8, %v80_v5  ;;  %v204_v10 = vmax.f32 %v198_v7, 0.0 }
 0x10a   :  { %v201_v11 = vpop.f32.mrf.mxu0 }
 0x10b   :  { %v205_v12 = vmax.f32 %v200_v9, 0.0  ;;  %v206_v15 = vpack.c.bf16 %v204_v10, %v204_v10 }
 0x10c   :  { %v202_v13 = vpop.f32.mrf.mxu0 }
 0x10d   :  { %v207_v14 = vpack.c.bf16 %v205_v12, %v205_v12 }
 0x10f   :  { %445 = vmatprep.mubr.bf16.mxu1 %v207_v14 }
 0x110   :  { %446 = vmatmul.mubr.bf16.vlgmr.msra.gmra.mxu1 %v206_v15 }
 0x1d0   :  { %v447_v23 = vpop.f32.mrf.mxu1 }
 0x1d1   :  { %v448_v24 = vadd.f32 %v447_v23, %v246_v21 }
 0x1d2   :  { %v449_v25 = vpop.f32.mrf.mxu1 }
 0x1d3   :  { %v450_v26 = vadd.f32 %v449_v25, %v250_v22  ;;  %v454_v27 = vmax.f32 %v448_v24, 0.0 }
 0x1d4   :  { %v451_v28 = vpop.f32.mrf.mxu1 }
 0x1d5   :  { %v455_v29 = vmax.f32 %v450_v26, 0.0  ;;  %v456_v32 = vpack.c.bf16 %v454_v27, %v454_v27 }
 0x1d6   :  { %v452_v30 = vpop.f32.mrf.mxu1 }
 0x1d7   :  { %v457_v31 = vpack.c.bf16 %v455_v29, %v455_v29 }
 0x1d9   :  { %623 = vmatprep.mubr.bf16.mxu0 %v457_v31 }
 0x1da   :  { %624 = vmatmul.mubr.bf16.vlgmr.msra.gmra.mxu0 %v456_v32 }
 0x29a   :  { %v729_v33 = vpop.f32.mrf.mxu0 }
 0x29c   :  { %v730_v35 = vpop.f32.mrf.mxu0 }
 0x29d   :  { %v731_v36 = vadd.f32 %v730_v35, %v729_v33 }
 0x29e   :  { %v732_v37 = vpop.f32.mrf.mxu0 }
 0x29f   :  { %v626_v38 = vadd.f32 %v731_v36, %v696_v34 }
 0x2a0   :  { %v733_v39 = vpop.f32.mrf.mxu0 }
 0x2a1   :  { %631 = vst [vmem:[#allocation8] sm:$0xff] %v626_v38 }
 0x2a2   :  { %901 = shalt.err (!%p898_p5)
}
 0x2a3   :  { %641 = dma.vmem_to_hbm [thread:$0]  %s639_s2, 128, %s958_s3, [#allocation4]  }
 0x2a4   :  { %914 = dma.done.wait [#allocation4], 128  }
 0x2a5   :  { %915 = vsyncadd [#allocation4], 4294967168 }
 0x2a6   :  { %645 = vsyncpa [#allocation3], 1 }
 0x2a7   :  { %646 = vsyncpa [#allocation6], 1 }
 0x2a8   :  { %647 = vsyncpa [#allocation4], 1 }

</bundles_post_ra>
